<compile_context>
chip_gen: v7x
topology: tpu7x:2x2x1
jax: 0.10.0
libtpu: 0.0.40
codegen_flags: <defaults>
</compile_context>

<pallas_src>
import functools

import jax
import jax.numpy as jnp
from jax.experimental import pallas as pl
from jax.experimental.pallas import tpu as pltpu

_LANE = 128
_SUBLANE = 8


def _round_up(x, m):
    return (x + m - 1) // m * m


def _conv1xk_kernel(x_ref, w_ref, b_ref, out_ref, *, K, valid_len):
    """One row-tile of  y[c, p] = b[c] + sum_{g,k} w[k, c, g] * x[g, p + k].

    x_ref  : (nin_p,  TILE)      VMEM  flattened rows (row stride Wrow), time on lanes
    w_ref  : (K, nout_p, nin_p)  VMEM  per-tap channel-mixing matrices (MXU operands)
    b_ref  : (nout_p, 1)         VMEM  bias
    out_ref: (nout_p, TILE)      VMEM  channel-major, lane-dense output tile
    """
    # Init the full tile with the bias (also covers the lane-aligned 128-col tail that the
    # per-tap matmuls below do not touch; those columns are row padding, sliced off in the
    # wrapper).  Single hoisted broadcast per grid step.
    out_ref[...] = jnp.broadcast_to(b_ref[...], out_ref.shape)
    for k in range(K):
        # One shifted slice per tap, shared by every input/output channel (one lane
        # rotate amortized over the whole (nout x nin) channel mix).
        xk = x_ref[:, k:k + valid_len]                               # (nin_p, valid_len)
        # Single unbatched 2-D MXU matmul per tap; accumulate into the VMEM output tile
        # so only one shifted slice is live at a time (bounded vreg pressure for big K).
        out_ref[:, :valid_len] += jnp.dot(
            w_ref[k], xk, preferred_element_type=jnp.float32)


def conv1xk(x, w, b, *, max_rows_per_tile=256, tile_budget_bytes=40 << 20):
    """nn.Conv2d(nin, nout, kernel_size=(1, K)) with VALID padding, NCHW / (nout,nin,K).

    x: (N, nin, H, W) f32;  w: (nout, nin, K);  b: (nout,).
    Returns (N, nout, H, W - K + 1) f32.
    """
    N, nin, H, W = x.shape
    nout, nin_w, K = w.shape
    assert nin_w == nin
    assert K - 1 <= _LANE, "taps beyond 129 need a wider per-row tail reservation"
    Wout = W - K + 1
    R = N * H

    # Pad channel dims to sublane multiples (zero channels / zero weights: exact math).
    nin_p = _round_up(nin, _SUBLANE)
    nout_p = _round_up(nout, _SUBLANE)

    # Flattened row-major layout: each (n, h) row occupies Wrow lanes.  Wrow must
    #  (a) hold the full input row (W cols) and
    #  (b) keep every valid output clear of the last 128 columns of its row, so the
    #      kernel's per-tap matmuls can stop on a lane-aligned boundary with no halo DMA.
    Wrow = _round_up(max(W, Wout + _LANE), _LANE)

    # Row tile: biggest that fits the tile budget (v7x has only 64 MiB VMEM / TC), but
    # keep >= 2 grid steps so both v7x TensorCores get work under "parallel" semantics.
    bytes_per_row = 4 * 2 * Wrow * (nin_p + nout_p)          # double-buffered in + out
    tr_cap = max(_SUBLANE,
                 (tile_budget_bytes // bytes_per_row) // _SUBLANE * _SUBLANE)
    TR = min(max_rows_per_tile, tr_cap, _round_up(R, _SUBLANE))
    if R > _SUBLANE:
        TR = min(TR, max(_SUBLANE, _round_up((R + 1) // 2, _SUBLANE)))
    R_pad = _round_up(R, TR)
    grid = (R_pad // TR,)
    TILE = TR * Wrow
    valid_len = TILE - _LANE

    # Layout plumbing only (wrapper-side XLA, not kernel work).
    x_ch = jnp.transpose(x, (1, 0, 2, 3)).reshape(nin, R, W).astype(jnp.float32)
    x_p = jnp.zeros((nin_p, R_pad, Wrow), jnp.float32).at[:nin, :R, :W].set(x_ch)
    x_flat = x_p.reshape(nin_p, R_pad * Wrow)
    w_taps = jnp.zeros((K, nout_p, nin_p), jnp.float32).at[:, :nout, :nin].set(
        jnp.transpose(w.astype(jnp.float32), (2, 0, 1)))
    b_p = jnp.zeros((nout_p, 1), jnp.float32).at[:nout, 0].set(b.astype(jnp.float32))

    # VMEM: double-buffered in/out tiles + resident weights/bias; never above v7x's 64 MiB.
    est = 4 * (2 * nin_p * TILE + 2 * nout_p * TILE + K * nout_p * nin_p + nout_p)
    vmem_limit = int(min(max(2 * est, 32 << 20), 56 << 20))

    kernel = functools.partial(_conv1xk_kernel, K=K, valid_len=valid_len)
    out_flat = pl.pallas_call(
        kernel,
        out_shape=jax.ShapeDtypeStruct((nout_p, R_pad * Wrow), jnp.float32),
        grid=grid,
        in_specs=[
            pl.BlockSpec((nin_p, TILE), lambda i: (0, i)),         # pipelined input rows
            pl.BlockSpec(memory_space=pltpu.MemorySpace.VMEM),     # per-tap weights
            pl.BlockSpec(memory_space=pltpu.MemorySpace.VMEM),     # bias
        ],
        out_specs=pl.BlockSpec((nout_p, TILE), lambda i: (0, i)),  # lane-dense, ch-major
        compiler_params=pltpu.CompilerParams(
            dimension_semantics=("parallel",),
            vmem_limit_bytes=vmem_limit),
    )(x_flat, w_taps, b_p)

    out = out_flat.reshape(nout_p, R_pad, Wrow)[:nout, :R, :Wout]
    return jnp.transpose(out.reshape(nout, N, H, Wout), (1, 0, 2, 3))


def depthwise_separable_conv(x, w_dw, b_dw, w_pw, b_pw, **kwargs):
    """Conv2d(nin, nout, (1,K), groups=nin) -> Conv2d(nout, nout, 1), fused exactly into a
    single (1,K) conv and run through the Pallas conv1xk kernel."""
    N, nin, H, W = x.shape
    nout = w_dw.shape[0]
    K = w_dw.shape[-1]
    assert nout % nin == 0, "groups=nin requires nout % nin == 0"
    mult = nout // nin
    wdw2 = w_dw.reshape(nout, K).astype(jnp.float32)
    wpw2 = w_pw.reshape(nout, nout).astype(jnp.float32)
    # Wc[c, g, k] = sum_m wpw[c, g*mult+m] * wdw[g*mult+m, k]   (PyTorch group semantics)
    w_c = jnp.einsum("cgm,gmk->cgk",
                     wpw2.reshape(nout, nin, mult),
                     wdw2.reshape(nin, mult, K))
    # b_eff = wpw @ b_dw + b_pw  (exact fold of the depthwise bias)
    b_eff = wpw2 @ b_dw.astype(jnp.float32) + b_pw.astype(jnp.float32)
    return conv1xk(x, w_c, b_eff, **kwargs)


def _reference(x, w_dw, b_dw, w_pw, b_pw):
    """Pure-JAX reference matching nn.Conv2d semantics (NCHW / OIHW)."""
    nin = x.shape[1]
    dn = ("NCHW", "OIHW", "NCHW")
    dw = jax.lax.conv_general_dilated(
        x, w_dw, window_strides=(1, 1), padding="VALID",
        feature_group_count=nin, dimension_numbers=dn)
    dw = dw + b_dw[None, :, None, None]
    pw = jax.lax.conv_general_dilated(
        dw, w_pw, window_strides=(1, 1), padding="VALID", dimension_numbers=dn)
    return pw + b_pw[None, :, None, None]


if __name__ == "__main__":
    # Small shapes consistent with the module's conv building block: nin=4, nout=8, K=3.
    N, NIN, NOUT, K, H, W = 2, 4, 8, 3, 8, 16

    key = jax.random.PRNGKey(0)
    kx, k1, k2, k3, k4 = jax.random.split(key, 5)

    x = jax.random.normal(kx, (N, NIN, H, W), dtype=jnp.float32)
    # Parameter shapes mirror nn.Conv2d: depthwise weight (nout, 1, 1, K),
    # pointwise weight (nout, nout, 1, 1), plus biases.
    w_dw = 0.1 * jax.random.normal(k1, (NOUT, 1, 1, K), dtype=jnp.float32)
    b_dw = 0.1 * jax.random.normal(k2, (NOUT,), dtype=jnp.float32)
    w_pw = 0.1 * jax.random.normal(k3, (NOUT, NOUT, 1, 1), dtype=jnp.float32)
    b_pw = 0.1 * jax.random.normal(k4, (NOUT,), dtype=jnp.float32)

    out = depthwise_separable_conv(x, w_dw, b_dw, w_pw, b_pw)
    out = jax.block_until_ready(out)

    ref = _reference(x, w_dw, b_dw, w_pw, b_pw)
    assert out.shape == (N, NOUT, H, W - K + 1), out.shape
    assert jnp.allclose(out, ref, atol=1e-5, rtol=1e-5), "mismatch vs reference conv"

    print("KERNEL_OK")
</pallas_src>

<mosaic_0001>
module attributes {stable_mosaic.version = 11 : i64} {
  func.func @_conv1xk_kernel(%arg0: i32, %arg1: memref<8x2048xf32, #tpu.memory_space<vmem>>, %arg2: memref<3x8x8xf32, #tpu.memory_space<vmem>>, %arg3: memref<8x1xf32, #tpu.memory_space<vmem>>, %arg4: memref<8x2048xf32, #tpu.memory_space<vmem>>) attributes {dimension_semantics = [#tpu.dimension_semantics<parallel>], iteration_bounds = array<i64: 2>, scalar_prefetch = 0 : i64, scratch_operands = 0 : i64, tpu.core_type = #tpu.core_type<tc>, window_params = [{transform_indices = @transform_0, window_bounds = array<i64: 8, 2048>}, {pipeline_mode = #tpu.pipeline_mode<synchronous>, transform_indices = @transform_1, window_bounds = array<i64: 3, 8, 8>}, {pipeline_mode = #tpu.pipeline_mode<synchronous>, transform_indices = @transform_2, window_bounds = array<i64: 8, 1>}, {transform_indices = @transform_3, window_bounds = array<i64: 8, 2048>}]} {
    %c0 = arith.constant 0 : index
    %c0_0 = arith.constant 0 : index
    %0 = vector.load %arg3[%c0, %c0_0] : memref<8x1xf32, #tpu.memory_space<vmem>>, vector<8x1xf32>
    %1 = vector.shape_cast %0 : vector<8x1xf32> to vector<8x1xf32>
    %2 = vector.broadcast %1 : vector<8x1xf32> to vector<8x2048xf32>
    %c0_1 = arith.constant 0 : index
    %c0_2 = arith.constant 0 : index
    %3 = vector.load %arg4[%c0_1, %c0_2] : memref<8x2048xf32, #tpu.memory_space<vmem>>, vector<8x2048xf32>
    tpu.vector_store %arg4[%c0_1, %c0_2], %2 {strides = array<i32>} : memref<8x2048xf32, #tpu.memory_space<vmem>>, vector<8x2048xf32>,
    %c0_3 = arith.constant 0 : index
    %c0_4 = arith.constant 0 : index
    %4 = vector.load %arg1[%c0_3, %c0_4] : memref<8x2048xf32, #tpu.memory_space<vmem>>, vector<8x1920xf32>
    %c0_5 = arith.constant 0 : index
    %c0_6 = arith.constant 0 : index
    %5 = vector.load %arg4[%c0_5, %c0_6] : memref<8x2048xf32, #tpu.memory_space<vmem>>, vector<8x1920xf32>
    %c0_7 = arith.constant 0 : index
    %c0_8 = arith.constant 0 : index
    %c0_9 = arith.constant 0 : index
    %6 = vector.load %arg2[%c0_7, %c0_8, %c0_9] : memref<3x8x8xf32, #tpu.memory_space<vmem>>, vector<1x8x8xf32>
    %7 = vector.shape_cast %6 : vector<1x8x8xf32> to vector<8x8xf32>
    %cst = arith.constant dense<0.000000e+00> : vector<8x1920xf32>
    %8 = tpu.matmul %7, %4, %cst {dimension_numbers = #tpu.dot_dimension_numbers<[1], [0], [0], [1], [0, 0, 1, 1], [], []>} : vector<8x8xf32>, vector<8x1920xf32>, vector<8x1920xf32> -> vector<8x1920xf32>
    %9 = arith.addf %5, %8 : vector<8x1920xf32>
    %c0_10 = arith.constant 0 : index
    %c0_11 = arith.constant 0 : index
    %10 = vector.load %arg4[%c0_10, %c0_11] : memref<8x2048xf32, #tpu.memory_space<vmem>>, vector<8x1920xf32>
    tpu.vector_store %arg4[%c0_10, %c0_11], %9 {strides = array<i32>} : memref<8x2048xf32, #tpu.memory_space<vmem>>, vector<8x1920xf32>,
    %c0_12 = arith.constant 0 : index
    %c1 = arith.constant 1 : index
    %11 = vector.load %arg1[%c0_12, %c1] : memref<8x2048xf32, #tpu.memory_space<vmem>>, vector<8x1920xf32>
    %c0_13 = arith.constant 0 : index
    %c0_14 = arith.constant 0 : index
    %12 = vector.load %arg4[%c0_13, %c0_14] : memref<8x2048xf32, #tpu.memory_space<vmem>>, vector<8x1920xf32>
    %c1_15 = arith.constant 1 : index
    %c0_16 = arith.constant 0 : index
    %c0_17 = arith.constant 0 : index
    %13 = vector.load %arg2[%c1_15, %c0_16, %c0_17] : memref<3x8x8xf32, #tpu.memory_space<vmem>>, vector<1x8x8xf32>
    %14 = vector.shape_cast %13 : vector<1x8x8xf32> to vector<8x8xf32>
    %cst_18 = arith.constant dense<0.000000e+00> : vector<8x1920xf32>
    %15 = tpu.matmul %14, %11, %cst_18 {dimension_numbers = #tpu.dot_dimension_numbers<[1], [0], [0], [1], [0, 0, 1, 1], [], []>} : vector<8x8xf32>, vector<8x1920xf32>, vector<8x1920xf32> -> vector<8x1920xf32>
    %16 = arith.addf %12, %15 : vector<8x1920xf32>
    %c0_19 = arith.constant 0 : index
    %c0_20 = arith.constant 0 : index
    %17 = vector.load %arg4[%c0_19, %c0_20] : memref<8x2048xf32, #tpu.memory_space<vmem>>, vector<8x1920xf32>
    tpu.vector_store %arg4[%c0_19, %c0_20], %16 {strides = array<i32>} : memref<8x2048xf32, #tpu.memory_space<vmem>>, vector<8x1920xf32>,
    %c0_21 = arith.constant 0 : index
    %c2 = arith.constant 2 : index
    %18 = vector.load %arg1[%c0_21, %c2] : memref<8x2048xf32, #tpu.memory_space<vmem>>, vector<8x1920xf32>
    %c0_22 = arith.constant 0 : index
    %c0_23 = arith.constant 0 : index
    %19 = vector.load %arg4[%c0_22, %c0_23] : memref<8x2048xf32, #tpu.memory_space<vmem>>, vector<8x1920xf32>
    %c2_24 = arith.constant 2 : index
    %c0_25 = arith.constant 0 : index
    %c0_26 = arith.constant 0 : index
    %20 = vector.load %arg2[%c2_24, %c0_25, %c0_26] : memref<3x8x8xf32, #tpu.memory_space<vmem>>, vector<1x8x8xf32>
    %21 = vector.shape_cast %20 : vector<1x8x8xf32> to vector<8x8xf32>
    %cst_27 = arith.constant dense<0.000000e+00> : vector<8x1920xf32>
    %22 = tpu.matmul %21, %18, %cst_27 {dimension_numbers = #tpu.dot_dimension_numbers<[1], [0], [0], [1], [0, 0, 1, 1], [], []>} : vector<8x8xf32>, vector<8x1920xf32>, vector<8x1920xf32> -> vector<8x1920xf32>
    %23 = arith.addf %19, %22 : vector<8x1920xf32>
    %c0_28 = arith.constant 0 : index
    %c0_29 = arith.constant 0 : index
    %24 = vector.load %arg4[%c0_28, %c0_29] : memref<8x2048xf32, #tpu.memory_space<vmem>>, vector<8x1920xf32>
    tpu.vector_store %arg4[%c0_28, %c0_29], %23 {strides = array<i32>} : memref<8x2048xf32, #tpu.memory_space<vmem>>, vector<8x1920xf32>,
    return
  }
  func.func @transform_0(%arg0: i32) -> (i32, i32) {
    %c0_i32 = arith.constant 0 : i32
    %c0_i32_0 = arith.constant 0 : i32
    return %c0_i32, %arg0 : i32, i32
  }
  func.func @transform_1(%arg0: i32) -> (i32, i32, i32) {
    %c0_i32 = arith.constant 0 : i32
    %c0_i32_0 = arith.constant 0 : i32
    %c0_i32_1 = arith.constant 0 : i32
    %c0_i32_2 = arith.constant 0 : i32
    return %c0_i32, %c0_i32_0, %c0_i32_1 : i32, i32, i32
  }
  func.func @transform_2(%arg0: i32) -> (i32, i32) {
    %c0_i32 = arith.constant 0 : i32
    %c0_i32_0 = arith.constant 0 : i32
    %c0_i32_1 = arith.constant 0 : i32
    return %c0_i32, %c0_i32_0 : i32, i32
  }
  func.func @transform_3(%arg0: i32) -> (i32, i32) {
    %c0_i32 = arith.constant 0 : i32
    %c0_i32_0 = arith.constant 0 : i32
    return %c0_i32, %arg0 : i32, i32
  }
}

</mosaic_0001>

<bundles_post_ra>
// kernel: tpu_custom_call.1
= control target key start
LH: loop header
LB: loop body
LE: loop exit
PB: predicated region body
PF: predicated region fallthrough
CT: control target
= control target key end

     0   :  { %8 = vsyncpa [#allocation3], 0  ;;  %s3097_s0 = inlined_call_operand.hbm [shape: f32[8,4096], index: 0, kind: input, shape index: {}]   ;;  %s3098_s1 = inlined_call_operand.hbm [shape: f32[3,8,8], index: 1, kind: input, shape index: {}]   ;;  %s3099_s2 = inlined_call_operand.vmem [shape: f32[8,1], index: 2, kind: input, shape index: {}]   ;;  %s3100_s3 = inlined_call_operand.hbm [shape: f32[8,4096], index: 3, kind: output, shape index: {}]  }
   0x1   :  { %10 = vsyncpa [#allocation3 + $0x1], 0 }
   0x2   :  { %11 = vsyncpa [#allocation6], 0 }
   0x3   :  { %12 = vsyncpa [#allocation4], 0 }
   0x4   :  { %14 = vsyncpa [#allocation4 + $0x1], 0  ;;  %s2742_s12 = smov 0   ;;  %s2744_s13 = smov 0  }
   0x5   :  { %s2746_s14 = smov 0   ;;  %s2748_s15 = smov 0  }
   0x6 LB: > { %s2763_s16 = sadd.s32 4294967295, %s2710_s15   ;;  %s2377_s17 = sadd.s32 4294967294, %s2710_s15   ;;  %s2710_s15 = sphi %s2748_s15, %s3120_s15   ;;  %s2706_s14 = sphi %s2746_s14, %s3119_s14   ;;  %s2702_s13 = sphi %s2744_s13, %s3118_s13   ;;  %s2698_s12 = sphi %s2742_s12, %s3117_s12  }
   0x7   : > { %p40_p0 = scmp.ne.s32.totalorder %s2702_s13, %s2698_s12  ;;  %p3101_p1 = scmp.eq.s32.totalorder %s2763_s16, 0 }
   0x8   : > { %p112_p3 = scmp.eq.s32.totalorder %s2377_s17, 1  ;;  %p2378_p5 = scmp.ge.s32.totalorder %s2710_s15, 1 }
   0x9   : > { %p2772_p4 = por %p3101_p1, %p40_p0  ;;  %p119_p7 = scmp.lt.s32.totalorder %s2710_s15, 3 }
   0xa   : > { %p2777_p6 = por %p112_p3, %p40_p0  ;;  %s2712_s21 = smov [#allocation5]  }
   0xb   : > { %s3104_s18 = scalar_select %p2772_p4, 1, 0 }
   0xc   : > { %s3105_s19 = scalar_select %p2777_p6, 1, 0 }
   0xd   : > { %p2782_p8 = pnand %p2378_p5, %p119_p7  ;;  %s131_s22 = sshll.u32 %s2712_s21, 4  ;;  %s2786_s22 = int_to_ptr.vmem [resolvable:$true] %s131_s22 }
   0xe   : > { %s2798_s24 = sadd.s32 1, %s2710_s15   ;;  %s27_s25 = sadd.s32 1, %s2706_s14 }
   0xf   : > { %s3106_s20 = scalar_select %p2782_p8, 1, 0 }
  0x10   : > { %p2525_p9 = pneg %p2782_p8  ;;  %s24_s26 = ssub.s32 %s2710_s15, %s2798_s24 }
  0x11   : > { %s2582_s29 = scalar_lea.hbm %s3098_s1, 384 }
  0x12   : > { %p2793_p11 = pnand %p2525_p9, %p3101_p1  ;;  %p2583_p12 = scmp.ne.s32.totalorder %s3098_s1, %s2582_s29 }
  0x13   : > { %p2589_p5 = scmp.lt.u32.totalorder %s2582_s29, %s3098_s1 }
  0x14   : > { %p2584_p13 = pneg %p2793_p11 }
  0x16   : > { %p2585_p0 = pnand %p2584_p13, %p2583_p12 }
  0x18   : > { %p2586_p3 = pneg %p2585_p0 }
  0x1a   : > { %p2591_p7 = pnand %p2589_p5, %p2586_p3 }
  0x1c   : > { %2594 = shalt.err (!%p2591_p7)
}
  0x1d   : > { %s2595_s7 = scalar_lea.vmem %s2786_s22, 384  ;;  %p2603_p2 = scmp.lt.s32.totalorder %s2786_s22, %s2786_s22 }
  0x1e   : > { %p2596_p9 = scmp.ne.s32.totalorder %s2786_s22, %s2595_s7  ;;  %p2604_p6 = scmp.lt.s32.totalorder %s2595_s7, %s2595_s7 }
  0x20   : > { %p2598_p10 = pnand %p2596_p9, %p2584_p13  ;;  %p2605_p4 = por %p2604_p6, %p2603_p2 }
  0x22   : > { %p2599_p1 = pneg %p2598_p10 }
  0x24   : > { %p2606_p8 = pnand %p2605_p4, %p2599_p1 }
  0x26   : > { %2609 = shalt.err (!%p2606_p8)
}
  0x27   : > { %s2713_s8 = smov 128   ;;  %s2714_s9 = smov 8  }
  0x28   : > { %2528 = dma.hbm_to_vmem [thread:$0]  (!%p2793_p11), %s3098_s1, 384, %s2786_s22, [#allocation6], %s2713_s8, %s2713_s8, %s2714_s9  }
  0x29   : > { %p25_p2 = scmp.eq.s32.totalorder %s24_s26, 0  ;;  %p34_p1 = scmp.ne.s32.totalorder %s2706_s14, %s2702_s13 }
  0x2a   : > { %p35_p4 = scmp.eq.s32.totalorder %s2710_s15, 0  ;;  %p2538_p6 = scmp.lt.s32.totalorder %s2710_s15, 2 }
  0x2b   : > { %s2829_s17 = scalar_select %p25_p2, %s2706_s14, %s27_s25  }
  0x2c   : > { %p36_p8 = por %p35_p4, %p34_p1  ;;  %p3108_p10 = scmp.eq.s32.totalorder %s2763_s16, 1 }
  0x2d   : > { %s148_s27 = sand.u32 1, %s2706_s14   ;;  %s2417_s28 = sshll.u32 %s2710_s15, 11 }
  0x2e   : > { %p2833_p12 = por %p3108_p10, %p34_p1  ;;  %s2381_s29 = sshll.u32 %s148_s27, 7 }
  0x2f   : > { %s2842_s4 = scalar_lea.hbm %s3097_s0, %s2417_s28  ;;  %s152_s22 = scalar_lea.vmem [#allocation2], %s2381_s29 }
  0x30   : > { %s160_s25 = sshll.u32 %s152_s22, 4  ;;  %p2844_p11 = pnand %p2538_p6, %p36_p8  ;;  %s2848_s25 = int_to_ptr.vmem [resolvable:$true] %s160_s25 }
  0x31   : > { %s149_s5 = scalar_lea.sflag [#allocation3], %s148_s27  ;;  %s2610_s6 = scalar_lea.hbm %s2842_s4, 2048 }
  0x32   : > { %p2611_p13 = scmp.ne.s32.totalorder %s2842_s4, %s2610_s6  ;;  %p2612_p0 = pneg %p2844_p11 }
  0x33   : > { %s2615_s9 = scalar_lea.hbm %s3097_s0, 4096  ;;  %p2616_p7 = scmp.lt.u32.totalorder %s2842_s4, %s3097_s0 }
  0x34   : > { %p2613_p3 = pnand %p2612_p0, %p2611_p13  ;;  %p2617_p9 = scmp.lt.u32.totalorder %s2615_s9, %s2610_s6 }
  0x35   : > { %p2619_p1 = scmp.lt.u32.totalorder %s2610_s6, %s2842_s4 }
  0x36   : > { %p2614_p5 = pneg %p2613_p3  ;;  %p2618_p2 = por %p2617_p9, %p2616_p7 }
  0x38   : > { %p2620_p4 = por %p2619_p1, %p2618_p2 }
  0x3a   : > { %p2621_p6 = pnand %p2620_p4, %p2614_p5 }
  0x3c   : > { %2624 = shalt.err (!%p2621_p6)
}
  0x3d   : > { %s2625_s27 = scalar_lea.vmem %s2848_s25, 2048  ;;  %s2715_s28 = smov [#allocation2]  }
  0x3e   : > { %p2626_p8 = scmp.ne.s32.totalorder %s2848_s25, %s2625_s27  ;;  %s2630_s29 = sshll.u32 %s2715_s28, 4  ;;  %s2631_s29 = int_to_ptr.vmem [resolvable:$false] %s2630_s29 }
  0x3f   : > { %s2632_s23 = scalar_lea.vmem %s2631_s29, 4096  ;;  %p2633_p3 = scmp.lt.s32.totalorder %s2848_s25, %s2631_s29 }
  0x40   : > { %p2628_p10 = pnand %p2626_p8, %p2612_p0  ;;  %p2634_p7 = scmp.lt.s32.totalorder %s2632_s23, %s2625_s27 }
  0x42   : > { %p2629_p13 = pneg %p2628_p10  ;;  %p2635_p9 = por %p2634_p7, %p2633_p3 }
  0x44   : > { %p2636_p2 = pnand %p2635_p9, %p2629_p13 }
  0x46   : > { %2639 = shalt.err (!%p2636_p2)
}
  0x47   : > { %2532 = dma.hbm_to_vmem [thread:$0]  (!%p2844_p11), %s2842_s4, 2048, %s2848_s25, %s149_s5  }
  0x48   : > { %p3111_p5 = scmp.ne.s32.totalorder %s3106_s20, 0 }
  0x49   : > { %s2878_s30 = sand.u32 (!%p3111_p5), 1, %s2702_s13   ;;  %p3112_p0 = scmp.ne.s32.totalorder (!%p3111_p5), %s3104_s18, 0 }
  0x4a   : > { %169 = sbr.rel (%p3111_p5) target bundleno = 494 (0x1ee), region = 32  ;;  %s2385_s22 = sshll.u32 (!%p3111_p5), %s2878_s30, 7 }
  0x4b   : > { %s172_s6 = scalar_lea.sflag (!%p3111_p5), [#allocation3], %s2878_s30  ;;  %s2884_s7 = scalar_lea.vmem (!%p3111_p5), [#allocation2], %s2385_s22 }
  0x51   : > { %2685 = dma.done.wait (%p3112_p0), %s172_s6, 2048  }
  0x52   : > { %2687 = vsyncadd (%p3112_p0), %s172_s6, 4294965248  ;;  %p3113_p11 = scmp.eq.s32.totalorder %s2763_s16, 0 }
  0x54   : > { %2689 = dma.done.wait (%p3113_p11), [#allocation6], 384   ;;  %p3114_p1 = pmov %p3113_p11 }
  0x55   : > { %v2716_v0 = vmov 0.0   ;;  %v2897_v1 = vld [vmem:[%s2884_s7 + $0x8] sm:$0xff]  ;;  %v2900_v2 = vld [vmem:[%s2884_s7] sm:$0xff]  ;;  %s2717_s18 = smov 127   ;;  %v2907_v3 = vld [vmem:[%s2884_s7 + $0x18] sm:$0xff]  ;;  %vm257_vm0 = vcmask 64512  }
  0x56   : > { %2691 = vsyncadd (%p3114_p1), [#allocation6], 4294966912  ;;  %325 = vmatprep.mubr.f32.mxu0 %v2716_v0  ;;  %396 = vmatprep.mubr.f32.mxu1 %v2716_v0  ;;  %v256_v4 = vld [vmem:[#allocation5] sm:$0xff]  ;;  %v860_v5 = vld [vmem:[%s2884_s7 + $0x10] sm:$0xff]  ;;  %vm2718_vm1 = vmmov 0   ;;  %s2719_s20 = smov 126  }
  0x57   : > { %909 = vrot.lane.b32.xlu0 %v2897_v1, %s2717_s18  ;;  %907 = vrot.lane.b32.xlu1 %v2900_v2, %s2717_s18  ;;  %v863_v6 = vld [vmem:[%s2884_s7 + $0x28] sm:$0xff]  ;;  %v862_v7 = vld [vmem:[%s2884_s7 + $0x20] sm:$0xff]  ;;  %v2720_v18 = vmov 0   ;;  %vm939_vm2 = vcmask 1039360   ;;  %vm1651_vm3 = vcmask 1031168   ;;  %v1602_v57 = vld [vmem:[#allocation5 + $0x10] sm:$0xff] }
  0x58   : > { %261 = vmatprep.subr.mxu0 %v2897_v1  ;;  %332 = vmatprep.subr.mxu1 %v2907_v3  ;;  %v865_v8 = vld [vmem:[%s2884_s7 + $0x38] sm:$0xff]  ;;  %v867_v9 = vld [vmem:[%s2884_s7 + $0x48] sm:$0xff]  ;;  %v864_v10 = vld [vmem:[%s2884_s7 + $0x30] sm:$0xff]  ;;  %s3030_s26 = scalar_lea.vmem [#allocation7], %s2385_s22  ;;  %s2418_s5 = sshll.u32 %s2763_s16, 11 }
  0x59   : > { %262 = vmatpush1.msra.mxu0 %v2900_v2  ;;  %333 = vmatpush1.msra.mxu1 %v860_v5  ;;  %v866_v11 = vld [vmem:[%s2884_s7 + $0x40] sm:$0xff]  ;;  %v869_v12 = vld [vmem:[%s2884_s7 + $0x58] sm:$0xff]  ;;  %v871_v13 = vld [vmem:[%s2884_s7 + $0x68] sm:$0xff]  ;;  %s2297_s8 = sshll.u32 %s3030_s26, 4  ;;  %s3050_s11 = scalar_lea.hbm %s3100_s3, %s2418_s5  ;;  %s3052_s8 = int_to_ptr.vmem [resolvable:$true] %s2297_s8 }
  0x5a   : > { %2388 = vmatmul.mubr.msk.f32.vlgmr.msra.gmra.mrb[0].mxu0 %vm257_vm0, %v256_v4  ;;  %403 = vmatprep.subr.mxu0 %v863_v6  ;;  %v868_v14 = vld [vmem:[%s2884_s7 + $0x50] sm:$0xff]  ;;  %v870_v15 = vld [vmem:[%s2884_s7 + $0x60] sm:$0xff]  ;;  %v873_v17 = vld [vmem:[%s2884_s7 + $0x78] sm:$0xff]  ;;  %s2283_s16 = scalar_lea.sflag [#allocation4], %s2878_s30  ;;  %s2640_s27 = scalar_lea.vmem %s3052_s8, 2048 }
  0x5b   : > { %911 = vrot.lane.b32.xlu0 %v860_v5, %s2717_s18  ;;  %913 = vrot.lane.b32.xlu1 %v2907_v3, %s2717_s18  ;;  %v872_v16 = vld [vmem:[%s2884_s7 + $0x70] sm:$0xff]  ;;  %v204_v19 = vld [vmem:[%s3099_s2] sm:$0xff]  ;;  %v890_v25 = vld [vmem:[#allocation5 + $0x8] sm:$0xff]  ;;  %p2641_p4 = scmp.ne.s32.totalorder %s3052_s8, %s2640_s27  ;;  %s2721_s28 = smov [#allocation7]  }
  0x5c   : > { %404 = vmatpush1.msra.mxu0 %v862_v7  ;;  %467 = vmatprep.mubr.f32.mxu0 %v2716_v0  ;;  %s2644_s29 = sshll.u32 %s2721_s28, 4  ;;  %s2645_s29 = int_to_ptr.vmem [resolvable:$false] %s2644_s29 }
  0x5d   : > { %2389 = vmatmul.mubr.msk.f32.vlgmr.msra.gmra.mrb[0].mxu1 %vm257_vm0, %v256_v4  ;;  %474 = vmatprep.subr.mxu1 %v865_v8  ;;  %p2642_p6 = pnand %p2641_p4, %p2833_p12  ;;  %s2646_s23 = scalar_lea.vmem %s2645_s29, 4096 }
  0x5e   : > { %2390 = vmatmul.mubr.msk.f32.vlgmr.msra.gmra.mrb[2].mxu0 %vm257_vm0, %v256_v4  ;;  %545 = vmatprep.subr.mxu0 %v867_v9  ;;  %p2647_p10 = scmp.lt.s32.totalorder %s3052_s8, %s2645_s29  ;;  %p2648_p13 = scmp.lt.s32.totalorder %s2646_s23, %s2640_s27 }
  0x5f   : > { %915 = vrot.lane.b32.xlu0 %v862_v7, %s2717_s18  ;;  %917 = vrot.lane.b32.xlu1 %v863_v6, %s2717_s18  ;;  %p2643_p8 = pneg %p2642_p6 }
  0x60   : > { %475 = vmatpush1.msra.mxu1 %v864_v10  ;;  %538 = vmatprep.mubr.f32.mxu1 %v2716_v0  ;;  %p2649_p3 = por %p2648_p13, %p2647_p10 }
  0x61   : > { %546 = vmatpush1.msra.mxu0 %v866_v11  ;;  %609 = vmatprep.mubr.f32.mxu0 %v2716_v0 }
  0x62   : > { %2391 = vmatmul.mubr.msk.f32.vlgmr.msra.gmra.mrb[2].mxu1 %vm257_vm0, %v256_v4  ;;  %2392 = vmatmul.mubr.msk.f32.vlgmr.msra.gmra.mrb[4].mxu0 %vm257_vm0, %v256_v4  ;;  %p2650_p7 = pnand %p2649_p3, %p2643_p8 }
  0x63   : > { %919 = vrot.lane.b32.xlu0 %v864_v10, %s2717_s18  ;;  %921 = vrot.lane.b32.xlu1 %v865_v8, %s2717_s18 }
  0x64   : > { %687 = vmatprep.subr.mxu0 %v871_v13  ;;  %616 = vmatprep.subr.mxu1 %v869_v12 }
  0x65   : > { %688 = vmatpush1.msra.mxu0 %v870_v15  ;;  %617 = vmatpush1.msra.mxu1 %v868_v14 }
  0x66   : > { %680 = vmatprep.mubr.f32.mxu1 %v2716_v0  ;;  %751 = vmatprep.mubr.f32.mxu0 %v2716_v0 }
  0x67   : > { %923 = vrot.lane.b32.xlu0 %v866_v11, %s2717_s18  ;;  %925 = vrot.lane.b32.xlu1 %v867_v9, %s2717_s18 }
  0x68   : > { %2393 = vmatmul.mubr.msk.f32.vlgmr.msra.gmra.mrb[4].mxu1 %vm257_vm0, %v256_v4  ;;  %2394 = vmatmul.mubr.msk.f32.vlgmr.msra.gmra.mrb[6].mxu0 %vm257_vm0, %v256_v4 }
  0x69   : > { %2425 = vmatprep.subr.mxu1 %v2716_v0  ;;  %2427 = vmatprep.mubr.msk.f32.mxu1 %vm2718_vm1, %v2716_v0 }
  0x6a   : > { %2426 = vmatpush3.msra.mxu1 %v872_v16  ;;  %1037 = vmatprep.mubr.f32.mxu0 %v2716_v0 }
  0x6b   : > { %927 = vrot.lane.b32.xlu0 %v868_v14, %s2717_s18  ;;  %929 = vrot.lane.b32.xlu1 %v869_v12, %s2717_s18 }
  0x6c   : > { %2428 = vmatmul.mubr.msk.f32.vlgmr.msra.gmra.mrb[6].mxu1 %vm257_vm0, %v256_v4  ;;  %2581 = vset.pattern.permute.xlu0 %v2720_v18 }
  0x6d   : > { %1108 = vmatprep.mubr.f32.mxu1 %v2716_v0 }
  0x6f   : > { %931 = vrot.lane.b32.xlu0 %v870_v15, %s2717_s18  ;;  %933 = vrot.lane.b32.xlu1 %v871_v13, %s2717_s18 }
  0x73   : > { %935 = vrot.lane.b32.xlu0 %v872_v16, %s2717_s18  ;;  %937 = vrot.lane.b32.xlu1 %v873_v17, %s2717_s18 }
  0x77   : > { %1621 = vrot.lane.b32.xlu0 %v2897_v1, %s2719_s20  ;;  %1623 = vrot.lane.b32.xlu1 %v860_v5, %s2719_s20 }
  0x7b   : > { %1619 = vrot.lane.b32.xlu0 %v2900_v2, %s2719_s20  ;;  %1625 = vrot.lane.b32.xlu1 %v2907_v3, %s2719_s20 }
  0x7f   : > { %1627 = vrot.lane.b32.xlu0 %v862_v7, %s2719_s20  ;;  %1629 = vrot.lane.b32.xlu1 %v863_v6, %s2719_s20 }
  0x83   : > { %1631 = vrot.lane.b32.xlu0 %v864_v10, %s2719_s20  ;;  %1633 = vrot.lane.b32.xlu1 %v865_v8, %s2719_s20 }
  0x87   : > { %1635 = vrot.lane.b32.xlu0 %v866_v11, %s2719_s20  ;;  %1637 = vrot.lane.b32.xlu1 %v867_v9, %s2719_s20 }
  0x8b   : > { %1639 = vrot.lane.b32.xlu0 %v868_v14, %s2719_s20  ;;  %1641 = vrot.lane.b32.xlu1 %v869_v12, %s2719_s20 }
  0x8f   : > { %1643 = vrot.lane.b32.xlu0 %v870_v15, %s2719_s20  ;;  %1645 = vrot.lane.b32.xlu1 %v871_v13, %s2719_s20 }
  0x93   : > { %1647 = vrot.lane.b32.xlu0 %v872_v16, %s2719_s20  ;;  %1649 = vrot.lane.b32.xlu1 %v873_v17, %s2719_s20 }
  0x97   : > { %207 = vperm.xlu0 %2581, %v204_v19  }
  0xc9   : > { %v910_v20 = vpop.permute.xlu0 %909  ;;  %v908_v21 = vpop.permute.xlu1 %907 }
  0xca   : > { %v940_v26 = vsel %vm939_vm2, %v908_v21, %v910_v20 }
  0xcd   : > { %v912_v22 = vpop.permute.xlu0 %911  ;;  %v914_v23 = vpop.permute.xlu1 %913 }
  0xce   : > { %v941_v24 = vsel %vm939_vm2, %v910_v20, %v912_v22  ;;  %v942_v30 = vsel %vm939_vm2, %v912_v22, %v914_v23 }
  0xcf   : > { %973 = vmatprep.subr.mxu0 %v941_v24 }
  0xd0   : > { %974 = vmatpush1.msra.mxu0 %v940_v26 }
  0xd1   : > { %v916_v27 = vpop.permute.xlu0 %915  ;;  %v918_v28 = vpop.permute.xlu1 %917  ;;  %2396 = vmatmul.mubr.msk.f32.vlgmr.msra.gmra.mrb[0].mxu0 %vm257_vm0, %v890_v25 }
  0xd2   : > { %v943_v29 = vsel %vm939_vm2, %v914_v23, %v916_v27  ;;  %1179 = vmatprep.mubr.f32.mxu0 %v2716_v0  ;;  %v944_v34 = vsel %vm939_vm2, %v916_v27, %v918_v28 }
  0xd3   : > { %1044 = vmatprep.subr.mxu1 %v943_v29 }
  0xd4   : > { %1045 = vmatpush1.msra.mxu1 %v942_v30 }
  0xd5   : > { %v920_v31 = vpop.permute.xlu0 %919  ;;  %v922_v32 = vpop.permute.xlu1 %921  ;;  %2397 = vmatmul.mubr.msk.f32.vlgmr.msra.gmra.mrb[0].mxu1 %vm257_vm0, %v890_v25 }
  0xd6   : > { %v945_v33 = vsel %vm939_vm2, %v918_v28, %v920_v31  ;;  %1250 = vmatprep.mubr.f32.mxu1 %v2716_v0  ;;  %v946_v38 = vsel %vm939_vm2, %v920_v31, %v922_v32 }
  0xd7   : > { %1115 = vmatprep.subr.mxu0 %v945_v33 }
  0xd8   : > { %1116 = vmatpush1.msra.mxu0 %v944_v34 }
  0xd9   : > { %v924_v35 = vpop.permute.xlu0 %923  ;;  %v926_v36 = vpop.permute.xlu1 %925  ;;  %2398 = vmatmul.mubr.msk.f32.vlgmr.msra.gmra.mrb[2].mxu0 %vm257_vm0, %v890_v25 }
  0xda   : > { %v947_v37 = vsel %vm939_vm2, %v922_v32, %v924_v35  ;;  %1321 = vmatprep.mubr.f32.mxu0 %v2716_v0  ;;  %v948_v42 = vsel %vm939_vm2, %v924_v35, %v926_v36 }
  0xdb   : > { %1186 = vmatprep.subr.mxu1 %v947_v37 }
  0xdc   : > { %1187 = vmatpush1.msra.mxu1 %v946_v38 }
  0xdd   : > { %v928_v39 = vpop.permute.xlu0 %927  ;;  %v930_v40 = vpop.permute.xlu1 %929  ;;  %2399 = vmatmul.mubr.msk.f32.vlgmr.msra.gmra.mrb[2].mxu1 %vm257_vm0, %v890_v25 }
  0xde   : > { %v949_v41 = vsel %vm939_vm2, %v926_v36, %v928_v39  ;;  %1392 = vmatprep.mubr.f32.mxu1 %v2716_v0  ;;  %v950_v46 = vsel %vm939_vm2, %v928_v39, %v930_v40 }
  0xdf   : > { %1257 = vmatprep.subr.mxu0 %v949_v41 }
  0xe0   : > { %1258 = vmatpush1.msra.mxu0 %v948_v42 }
  0xe1   : > { %v932_v43 = vpop.permute.xlu0 %931  ;;  %v934_v44 = vpop.permute.xlu1 %933  ;;  %2400 = vmatmul.mubr.msk.f32.vlgmr.msra.gmra.mrb[4].mxu0 %vm257_vm0, %v890_v25 }
  0xe2   : > { %v951_v45 = vsel %vm939_vm2, %v930_v40, %v932_v43  ;;  %1463 = vmatprep.mubr.f32.mxu0 %v2716_v0  ;;  %v952_v51 = vsel %vm939_vm2, %v932_v43, %v934_v44 }
  0xe3   : > { %1328 = vmatprep.subr.mxu1 %v951_v45 }
  0xe4   : > { %1329 = vmatpush1.msra.mxu1 %v950_v46 }
  0xe5   : > { %v936_v47 = vpop.permute.xlu0 %935  ;;  %v938_v48 = vpop.permute.xlu1 %937  ;;  %2430 = vmatprep.subr.mxu1 %v2716_v0  ;;  %2401 = vmatmul.mubr.msk.f32.vlgmr.msra.gmra.mrb[4].mxu1 %vm257_vm0, %v890_v25 }
  0xe6   : > { %v954_v49 = vsel %vm939_vm2, %v936_v47, %v938_v48  ;;  %v953_v50 = vsel %vm939_vm2, %v934_v44, %v936_v47  ;;  %2432 = vmatprep.mubr.msk.f32.mxu1 %vm2718_vm1, %v2716_v0 }
  0xe7   : > { %1399 = vmatprep.subr.mxu0 %v953_v50  ;;  %2431 = vmatpush3.msra.mxu1 %v954_v49 }
  0xe8   : > { %1400 = vmatpush1.msra.mxu0 %v952_v51 }
  0xe9   : > { %v1622_v52 = vpop.permute.xlu0 %1621  ;;  %v1624_v53 = vpop.permute.xlu1 %1623  ;;  %2402 = vmatmul.mubr.msk.f32.vlgmr.msra.gmra.mrb[6].mxu0 %vm257_vm0, %v890_v25  ;;  %2433 = vmatmul.mubr.msk.f32.vlgmr.msra.gmra.mrb[6].mxu1 %vm257_vm0, %v890_v25 }
  0xea   : > { %v1653_v54 = vsel %vm1651_vm3, %v1622_v52, %v1624_v53  ;;  %1749 = vmatprep.mubr.f32.mxu0 %v2716_v0  ;;  %1820 = vmatprep.mubr.f32.mxu1 %v2716_v0 }
  0xeb   : > { %1685 = vmatprep.subr.mxu0 %v1653_v54 }
  0xed   : > { %v1620_v55 = vpop.permute.xlu0 %1619  ;;  %v1626_v56 = vpop.permute.xlu1 %1625 }
  0xee   : > { %v1652_v58 = vsel %vm1651_vm3, %v1620_v55, %v1622_v52  ;;  %v1654_v62 = vsel %vm1651_vm3, %v1624_v53, %v1626_v56 }
  0xef   : > { %1686 = vmatpush1.msra.mxu0 %v1652_v58 }
  0xf0   : > { %2404 = vmatmul.mubr.msk.f32.vlgmr.msra.gmra.mrb[0].mxu0 %vm257_vm0, %v1602_v57 }
  0xf1   : > { %v1628_v59 = vpop.permute.xlu0 %1627  ;;  %v1630_v60 = vpop.permute.xlu1 %1629  ;;  %1891 = vmatprep.mubr.f32.mxu0 %v2716_v0 }
  0xf2   : > { %v1655_v61 = vsel %vm1651_vm3, %v1626_v56, %v1628_v59  ;;  %v1656_v3 = vsel %vm1651_vm3, %v1628_v59, %v1630_v60 }
  0xf3   : > { %1756 = vmatprep.subr.mxu1 %v1655_v61 }
  0xf4   : > { %1757 = vmatpush1.msra.mxu1 %v1654_v62 }
  0xf5   : > { %v1632_v63 = vpop.permute.xlu0 %1631  ;;  %v1634_v1 = vpop.permute.xlu1 %1633  ;;  %2405 = vmatmul.mubr.msk.f32.vlgmr.msra.gmra.mrb[0].mxu1 %vm257_vm0, %v1602_v57 }
  0xf6   : > { %v1657_v2 = vsel %vm1651_vm3, %v1630_v60, %v1632_v63  ;;  %1962 = vmatprep.mubr.f32.mxu1 %v2716_v0  ;;  %v1658_v7 = vsel %vm1651_vm3, %v1632_v63, %v1634_v1 }
  0xf7   : > { %1827 = vmatprep.subr.mxu0 %v1657_v2 }
  0xf8   : > { %1828 = vmatpush1.msra.mxu0 %v1656_v3 }
  0xf9   : > { %v1636_v4 = vpop.permute.xlu0 %1635  ;;  %v1638_v5 = vpop.permute.xlu1 %1637  ;;  %2406 = vmatmul.mubr.msk.f32.vlgmr.msra.gmra.mrb[2].mxu0 %vm257_vm0, %v1602_v57 }
  0xfa   : > { %v1659_v6 = vsel %vm1651_vm3, %v1634_v1, %v1636_v4  ;;  %2033 = vmatprep.mubr.f32.mxu0 %v2716_v0  ;;  %v1660_v11 = vsel %vm1651_vm3, %v1636_v4, %v1638_v5 }
  0xfb   : > { %1898 = vmatprep.subr.mxu1 %v1659_v6 }
  0xfc   : > { %1899 = vmatpush1.msra.mxu1 %v1658_v7 }
  0xfd   : > { %v1640_v8 = vpop.permute.xlu0 %1639  ;;  %v1642_v9 = vpop.permute.xlu1 %1641  ;;  %2407 = vmatmul.mubr.msk.f32.vlgmr.msra.gmra.mrb[2].mxu1 %vm257_vm0, %v1602_v57 }
  0xfe   : > { %v1661_v10 = vsel %vm1651_vm3, %v1638_v5, %v1640_v8  ;;  %2104 = vmatprep.mubr.f32.mxu1 %v2716_v0  ;;  %v1662_v15 = vsel %vm1651_vm3, %v1640_v8, %v1642_v9 }
  0xff   : > { %1969 = vmatprep.subr.mxu0 %v1661_v10 }
 0x100   : > { %1970 = vmatpush1.msra.mxu0 %v1660_v11 }
 0x101   : > { %v1644_v12 = vpop.permute.xlu0 %1643  ;;  %v1646_v13 = vpop.permute.xlu1 %1645  ;;  %2408 = vmatmul.mubr.msk.f32.vlgmr.msra.gmra.mrb[4].mxu0 %vm257_vm0, %v1602_v57 }
 0x102   : > { %v1663_v14 = vsel %vm1651_vm3, %v1642_v9, %v1644_v12  ;;  %2175 = vmatprep.mubr.f32.mxu0 %v2716_v0  ;;  %v1664_v20 = vsel %vm1651_vm3, %v1644_v12, %v1646_v13 }
 0x103   : > { %2040 = vmatprep.subr.mxu1 %v1663_v14 }
 0x104   : > { %2041 = vmatpush1.msra.mxu1 %v1662_v15 }
 0x105   : > { %v1648_v16 = vpop.permute.xlu0 %1647  ;;  %v1650_v17 = vpop.permute.xlu1 %1649  ;;  %2409 = vmatmul.mubr.msk.f32.vlgmr.msra.gmra.mrb[4].mxu1 %vm257_vm0, %v1602_v57  ;;  %2435 = vmatprep.subr.mxu1 %v2716_v0 }
 0x106   : > { %v1666_v18 = vsel %vm1651_vm3, %v1648_v16, %v1650_v17  ;;  %v1665_v19 = vsel %vm1651_vm3, %v1646_v13, %v1648_v16  ;;  %2437 = vmatprep.mubr.msk.f32.mxu1 %vm2718_vm1, %v2716_v0 }
 0x107   : > { %2111 = vmatprep.subr.mxu0 %v1665_v19  ;;  %2436 = vmatpush3.msra.mxu1 %v1666_v18 }
 0x108   : > { %2112 = vmatpush1.msra.mxu0 %v1664_v20 }
 0x109   : > { %2410 = vmatmul.mubr.msk.f32.vlgmr.msra.gmra.mrb[6].mxu0 %vm257_vm0, %v1602_v57  ;;  %2438 = vmatmul.mubr.msk.f32.vlgmr.msra.gmra.mrb[6].mxu1 %vm257_vm0, %v1602_v57 }
 0x116   : > { %v208_v21 = vpop.permute.xlu0 %207 }
 0x117   : > { %225 = vst [vmem:[%s3030_s26 + $0x78] sm:$0xff] %v208_v21 }
 0x1c3   : > { %v1751_v0 = vpop.f32.mrb[0].mxu0 }
 0x1c4   : > { %v2442_v22 = vadd.f32 %v1751_v0, %v208_v21  ;;  %v1753_v23 = vpop.f32.mrb[1].mxu0 }
 0x1c5   : > { %v2445_v24 = vadd.f32 %v1753_v23, %v208_v21 }
 0x1c6   : > { %2267 = vst [vmem:[%s3030_s26] sm:$0xff] %v2442_v22 }
 0x1c7   : > { %2268 = vst [vmem:[%s3030_s26 + $0x8] sm:$0xff] %v2445_v24 }
 0x1c8   : > { %v1822_v25 = vpop.f32.mrb[0].mxu1 }
 0x1c9   : > { %v2448_v26 = vadd.f32 %v1822_v25, %v208_v21  ;;  %v1824_v27 = vpop.f32.mrb[1].mxu1 }
 0x1ca   : > { %v2451_v28 = vadd.f32 %v1824_v27, %v208_v21 }
 0x1cb   : > { %2269 = vst [vmem:[%s3030_s26 + $0x10] sm:$0xff] %v2448_v26 }
 0x1cc   : > { %2270 = vst [vmem:[%s3030_s26 + $0x18] sm:$0xff] %v2451_v28  ;;  %v1893_v29 = vpop.f32.mrb[2].mxu0 }
 0x1cd   : > { %v2454_v30 = vadd.f32 %v1893_v29, %v208_v21  ;;  %v1895_v31 = vpop.f32.mrb[3].mxu0 }
 0x1ce   : > { %v2457_v32 = vadd.f32 %v1895_v31, %v208_v21 }
 0x1cf   : > { %2271 = vst [vmem:[%s3030_s26 + $0x20] sm:$0xff] %v2454_v30 }
 0x1d0   : > { %2272 = vst [vmem:[%s3030_s26 + $0x28] sm:$0xff] %v2457_v32  ;;  %v1964_v33 = vpop.f32.mrb[2].mxu1 }
 0x1d1   : > { %v2460_v34 = vadd.f32 %v1964_v33, %v208_v21  ;;  %v1966_v35 = vpop.f32.mrb[3].mxu1 }
 0x1d2   : > { %v2463_v36 = vadd.f32 %v1966_v35, %v208_v21 }
 0x1d3   : > { %2273 = vst [vmem:[%s3030_s26 + $0x30] sm:$0xff] %v2460_v34 }
 0x1d4   : > { %2274 = vst [vmem:[%s3030_s26 + $0x38] sm:$0xff] %v2463_v36  ;;  %v2035_v37 = vpop.f32.mrb[4].mxu0 }
 0x1d5   : > { %v2466_v38 = vadd.f32 %v2035_v37, %v208_v21  ;;  %v2037_v39 = vpop.f32.mrb[5].mxu0 }
 0x1d6   : > { %v2469_v40 = vadd.f32 %v2037_v39, %v208_v21 }
 0x1d7   : > { %2275 = vst [vmem:[%s3030_s26 + $0x40] sm:$0xff] %v2466_v38 }
 0x1d8   : > { %2276 = vst [vmem:[%s3030_s26 + $0x48] sm:$0xff] %v2469_v40  ;;  %v2106_v41 = vpop.f32.mrb[4].mxu1 }
 0x1d9   : > { %v2472_v42 = vadd.f32 %v2106_v41, %v208_v21  ;;  %v2108_v43 = vpop.f32.mrb[5].mxu1 }
 0x1da   : > { %v2475_v44 = vadd.f32 %v2108_v43, %v208_v21 }
 0x1db   : > { %2277 = vst [vmem:[%s3030_s26 + $0x50] sm:$0xff] %v2472_v42 }
 0x1dc   : > { %2278 = vst [vmem:[%s3030_s26 + $0x58] sm:$0xff] %v2475_v44  ;;  %v2177_v45 = vpop.f32.mrb[6].mxu0  ;;  %v2248_v46 = vpop.f32.mrb[6].mxu1 }
 0x1dd   : > { %v2478_v47 = vadd.f32 %v2177_v45, %v208_v21  ;;  %v2484_v48 = vadd.f32 %v2248_v46, %v208_v21  ;;  %v2179_v49 = vpop.f32.mrb[7].mxu0  ;;  %v2439_v50 = vpop.f32.mrb[7].mxu1 }
 0x1de   : > { %v2481_v51 = vadd.f32 %v2179_v49, %v208_v21 }
 0x1df   : > { %2279 = vst [vmem:[%s3030_s26 + $0x60] sm:$0xff] %v2478_v47  ;;  %2281 = vst [vmem:[%s3030_s26 + $0x70] sm:$0xff] %v2484_v48 }
 0x1e0   : > { %2280 = vst [vmem:[%s3030_s26 + $0x68] sm:$0xff] %v2481_v51 }
 0x1e1   : > { %2653 = shalt.err (!%p2650_p7)
}
 0x1e2   : > { %s2654_s30 = scalar_lea.hbm %s3050_s11, 2048  ;;  %s2658_s7 = scalar_lea.hbm %s3100_s3, 4096 }
 0x1e3   : > { %p2655_p9 = scmp.ne.s32.totalorder %s3050_s11, %s2654_s30  ;;  %p2659_p0 = scmp.lt.u32.totalorder %s3050_s11, %s3100_s3 }
 0x1e4   : > { %p2660_p11 = scmp.lt.u32.totalorder %s2658_s7, %s2654_s30  ;;  %p2662_p4 = scmp.lt.u32.totalorder %s2654_s30, %s3050_s11 }
 0x1e5   : > { %p2656_p2 = pnand %p2655_p9, %p2833_p12 }
 0x1e6   : > { %p2661_p1 = por %p2660_p11, %p2659_p0 }
 0x1e7   : > { %p2657_p5 = pneg %p2656_p2 }
 0x1e8   : > { %p2663_p6 = por %p2662_p4, %p2661_p1 }
 0x1ea   : > { %p2664_p8 = pnand %p2663_p6, %p2657_p5 }
 0x1ec   : > { %2667 = shalt.err (!%p2664_p8)
}
 0x1ed   : > { %2523 = dma.vmem_to_hbm [thread:$0]  (%p2833_p12), %s3052_s8, 2048, %s3050_s11, %s2283_s16  }
 0x1ee PF: > { %s2309_s4 = sand.u32 1, %s2698_s12   ;;  %p3115_p10 = scmp.ne.s32.totalorder %s3105_s19, 0 }
 0x1ef   : > { %p3116_p13 = scmp.ge.s32.totalorder %s2710_s15, 2  ;;  %s2310_s25 = scalar_lea.sflag [#allocation4], %s2309_s4 }
 0x1f1   : > { %p2534_p3 = pnand %p3116_p13, %p3115_p10 }
 0x1f3   : > { %2693 = dma.done.wait (!%p2534_p3), %s2310_s25, 2048  }
 0x1f4   : > { %2695 = vsyncadd (!%p2534_p3), %s2310_s25, 4294965248  ;;  %p17_p7 = scmp.ge.s32.totalorder %s2798_s24, 4   ;;  %s3117_s12 = smov %s2702_s13 }
 0x1f5   : > { %s3118_s13 = smov %s2706_s14  ;;  %s3119_s14 = smov %s2829_s17 }
 0x1f6   : > { %s3120_s15 = smov %s2798_s24  ;;  %19 = sbr.rel (!%p17_p7) target bundleno = 6 (0x6), region = 83 }
 0x1fd   :  { %2315 = vsyncpa [#allocation3], 1 }
 0x1fe   :  { %2317 = vsyncpa [#allocation3 + $0x1], 1 }
 0x1ff   :  { %2318 = vsyncpa [#allocation6], 1 }
 0x200   :  { %2319 = vsyncpa [#allocation4], 1 }
 0x201   :  { %2321 = vsyncpa [#allocation4 + $0x1], 1 }

</bundles_post_ra>
